<compile_context>
chip_gen: v5e
topology: v5e:2x2
jax: 0.10.0
libtpu: 0.0.40
codegen_flags: <defaults>
</compile_context>

<pallas_src>
import jax
import jax.numpy as jnp
from jax import lax
from jax.experimental import pallas as pl
from jax.experimental.pallas import tpu as pltpu


def _round_up(x, m):
    return ((x + m - 1) // m) * m


def _integrate_kernel(vel_ref, dt_ref, pos_ref, out_ref, carry_ref):
    """One (row-tile, frame-chunk) step.

    vel_ref/dt_ref: (TR, TF)  rows = (batch, xyz) pairs, lanes = frames.
    pos_ref:        (TR, 1)   per-row initial position.
    carry_ref:      (TR, 1)   f32 running sum carried across frame chunks.
    """
    k = pl.program_id(1)

    @pl.when(k == 0)
    def _():
        carry_ref[...] = pos_ref[...].astype(jnp.float32)

    dp = vel_ref[...] * dt_ref[...]                          # (TR, TF)
    tf = dp.shape[-1]
    # Inclusive cumsum over the frame (lane) axis as dp @ U on the MXU,
    # with U[j, f] = 1 iff j <= f, generated in-kernel (VPU iota+compare).
    row = lax.broadcasted_iota(jnp.int32, (tf, tf), 0)
    col = lax.broadcasted_iota(jnp.int32, (tf, tf), 1)
    u = (row <= col).astype(dp.dtype)
    cum = jnp.dot(dp, u, preferred_element_type=jnp.float32)  # (TR, TF) f32

    carry = carry_ref[...]                                    # (TR, 1) f32
    out_ref[...] = (carry + cum).astype(out_ref.dtype)
    carry_ref[...] = carry + cum[:, tf - 1:tf]                # cross-chunk carry


def velocity_integrator_forward(dt, vel, pos):
    """Functional equivalent of Velocity_Integrator.forward.

    Args:
      dt:  (B, F, 1) / (F, 1) / (F,) time deltas (last dim 1 or 3).
      vel: (B, F, 3) velocities.
      pos: (3,) (or (1,1,3) / (B,3)) integrator state buffer.

    Returns:
      pos_traj: (B, F, 3) integrated positions.
      new_pos:  (B, 3)    updated state (= pos_traj[:, -1, :]).
    """
    dt = jnp.asarray(dt)
    vel = jnp.asarray(vel)
    pos = jnp.asarray(pos)

    # _check() handling. 1-D dt is treated as per-frame deltas (F,) -> (1, F, 1)
    # (the literal torch _check would give (1, 1, F) and silently truncate to
    # one frame, flagged as a bug in review).
    if dt.ndim == 2:
        dt = dt[None, ...]
    elif dt.ndim == 1:
        dt = dt[None, :, None]

    B_dt, F = dt.shape[:2]
    vel = vel[:, :F]
    B = B_dt if B_dt != 1 else vel.shape[0]

    out_dtype = jnp.result_type(dt.dtype, vel.dtype, pos.dtype)

    # Lane-dense layout: xyz folded into rows, frames on the lane axis.
    vel_b = jnp.broadcast_to(vel, (B, F, 3))
    dt_b = jnp.broadcast_to(dt, (B, F, 3))
    vel_t = jnp.transpose(vel_b, (0, 2, 1)).reshape(B * 3, F)
    dt_t = jnp.transpose(dt_b, (0, 2, 1)).reshape(B * 3, F)
    pos_col = jnp.broadcast_to(jnp.reshape(pos, (-1, 3)), (B, 3))
    pos_col = pos_col.reshape(B * 3, 1).astype(jnp.float32)

    rows = B * 3
    TR = min(_round_up(rows, 8), 256)      # row tile: multiple of 8 sublanes
    Rp = _round_up(rows, TR)
    TF = min(_round_up(F, 128), 512)       # frame chunk: multiple of 128 lanes
    Fp = _round_up(F, TF)

    vel_t = jnp.pad(vel_t, ((0, Rp - rows), (0, Fp - F)))
    dt_t = jnp.pad(dt_t, ((0, Rp - rows), (0, Fp - F)))
    pos_col = jnp.pad(pos_col, ((0, Rp - rows), (0, 0)))

    grid = (Rp // TR, Fp // TF)
    out_isz = jnp.dtype(out_dtype).itemsize
    cost = pl.CostEstimate(
        flops=2 * Rp * Fp * TF,
        transcendentals=0,
        bytes_accessed=Rp * Fp * (jnp.dtype(vel_t.dtype).itemsize
                                  + jnp.dtype(dt_t.dtype).itemsize
                                  + out_isz),
    )

    out = pl.pallas_call(
        _integrate_kernel,
        out_shape=jax.ShapeDtypeStruct((Rp, Fp), out_dtype),
        grid=grid,
        in_specs=[
            pl.BlockSpec((TR, TF), lambda i, k: (i, k)),   # vel  (rows, frames)
            pl.BlockSpec((TR, TF), lambda i, k: (i, k)),   # dt   (rows, frames)
            pl.BlockSpec((TR, 1), lambda i, k: (i, 0)),    # initial position
        ],
        out_specs=pl.BlockSpec((TR, TF), lambda i, k: (i, k)),
        scratch_shapes=[pltpu.VMEM((TR, 1), jnp.float32)],
        compiler_params=pltpu.CompilerParams(
            dimension_semantics=("parallel", "arbitrary")),
        cost_estimate=cost,
    )(vel_t, dt_t, pos_col)

    # Back to the module's (B, F, 3) convention.
    pos_traj = jnp.transpose(out[:rows, :F].reshape(B, 3, F), (0, 2, 1))
    # TODO(synk): PyTorch updates self.pos (a module buffer) in-place; the new
    # state is returned functionally here for the caller to carry.
    new_pos = pos_traj[:, -1, :]
    return pos_traj, new_pos


if __name__ == "__main__":
    key = jax.random.PRNGKey(0)
    k1, k2 = jax.random.split(key)

    B, F = 2, 8
    dt = jax.random.uniform(k1, (B, F, 1), dtype=jnp.float32) * 0.1
    vel = jax.random.normal(k2, (B, F, 3), dtype=jnp.float32)
    pos = jnp.zeros((3,), dtype=jnp.float32)  # default buffer: torch.zeros(3)

    pos_traj, new_pos = velocity_integrator_forward(dt, vel, pos)
    jax.block_until_ready(pos_traj)
    jax.block_until_ready(new_pos)

    # Pure-JAX reference (mirrors the PyTorch integrate()).
    ref = pos.reshape(1, 1, 3) + jnp.cumsum(vel * dt, axis=1)
    assert pos_traj.shape == (B, F, 3)
    assert jnp.allclose(pos_traj, ref, atol=1e-5), "kernel mismatch vs reference"
    assert jnp.allclose(new_pos, ref[:, -1, :], atol=1e-5), "state update mismatch"

    print("KERNEL_OK")
</pallas_src>

<mosaic_0001>
module attributes {stable_mosaic.version = 11 : i64} {
  func.func @_integrate_kernel(%arg0: i32, %arg1: i32, %arg2: memref<8x128xf32, #tpu.memory_space<vmem>>, %arg3: memref<8x128xf32, #tpu.memory_space<vmem>>, %arg4: memref<8x1xf32, #tpu.memory_space<vmem>>, %arg5: memref<8x128xf32, #tpu.memory_space<vmem>>, %arg6: memref<8x1xf32, #tpu.memory_space<vmem>>) attributes {dimension_semantics = [#tpu.dimension_semantics<parallel>, #tpu.dimension_semantics<arbitrary>], iteration_bounds = array<i64: 1, 1>, scalar_prefetch = 0 : i64, scratch_operands = 1 : i64, tpu.core_type = #tpu.core_type<tc>, window_params = [{transform_indices = @transform_0, window_bounds = array<i64: 8, 128>}, {transform_indices = @transform_1, window_bounds = array<i64: 8, 128>}, {transform_indices = @transform_2, window_bounds = array<i64: 8, 1>}, {transform_indices = @transform_3, window_bounds = array<i64: 8, 128>}]} {
    %c0_i32 = arith.constant 0 : i32
    %0 = arith.cmpi eq, %arg1, %c0_i32 : i32
    %1 = arith.extui %0 : i1 to i32
    %c0_i32_0 = arith.constant 0 : i32
    %2 = arith.cmpi ne, %1, %c0_i32_0 : i32
    scf.if %2 {
      %c0_10 = arith.constant 0 : index
      %c0_11 = arith.constant 0 : index
      %19 = vector.load %arg4[%c0_10, %c0_11] : memref<8x1xf32, #tpu.memory_space<vmem>>, vector<8x1xf32>
      %c0_12 = arith.constant 0 : index
      %c0_13 = arith.constant 0 : index
      %20 = vector.load %arg6[%c0_12, %c0_13] : memref<8x1xf32, #tpu.memory_space<vmem>>, vector<8x1xf32>
      tpu.vector_store %arg6[%c0_12, %c0_13], %19 {strides = array<i32>} : memref<8x1xf32, #tpu.memory_space<vmem>>, vector<8x1xf32>,
    } else {
    }
    %c0 = arith.constant 0 : index
    %c0_1 = arith.constant 0 : index
    %3 = vector.load %arg2[%c0, %c0_1] : memref<8x128xf32, #tpu.memory_space<vmem>>, vector<8x128xf32>
    %c0_2 = arith.constant 0 : index
    %c0_3 = arith.constant 0 : index
    %4 = vector.load %arg3[%c0_2, %c0_3] : memref<8x128xf32, #tpu.memory_space<vmem>>, vector<8x128xf32>
    %5 = arith.mulf %3, %4 : vector<8x128xf32>
    %6 = tpu.iota {dimensions = array<i32: 0>} : vector<128x128xi32>
    %7 = tpu.iota {dimensions = array<i32: 1>} : vector<128x128xi32>
    %8 = arith.cmpi sle, %6, %7 : vector<128x128xi32>
    %9 = arith.extui %8 : vector<128x128xi1> to vector<128x128xi32>
    %10 = arith.sitofp %9 : vector<128x128xi32> to vector<128x128xf32>
    %cst = arith.constant dense<0.000000e+00> : vector<8x128xf32>
    %11 = tpu.matmul %5, %10, %cst {dimension_numbers = #tpu.dot_dimension_numbers<[1], [0], [0], [1], [0, 0, 1, 1], [], []>} : vector<8x128xf32>, vector<128x128xf32>, vector<8x128xf32> -> vector<8x128xf32>
    %c0_4 = arith.constant 0 : index
    %c0_5 = arith.constant 0 : index
    %12 = vector.load %arg6[%c0_4, %c0_5] : memref<8x1xf32, #tpu.memory_space<vmem>>, vector<8x1xf32>
    %13 = vector.broadcast %12 : vector<8x1xf32> to vector<8x128xf32>
    %14 = arith.addf %13, %11 : vector<8x128xf32>
    %c0_6 = arith.constant 0 : index
    %c0_7 = arith.constant 0 : index
    %15 = vector.load %arg5[%c0_6, %c0_7] : memref<8x128xf32, #tpu.memory_space<vmem>>, vector<8x128xf32>
    tpu.vector_store %arg5[%c0_6, %c0_7], %14 {strides = array<i32>} : memref<8x128xf32, #tpu.memory_space<vmem>>, vector<8x128xf32>,
    %16 = vector.extract_strided_slice %11 {offsets = [0, 127], sizes = [8, 1], strides = [1, 1]} : vector<8x128xf32> to vector<8x1xf32>
    %17 = arith.addf %12, %16 : vector<8x1xf32>
    %c0_8 = arith.constant 0 : index
    %c0_9 = arith.constant 0 : index
    %18 = vector.load %arg6[%c0_8, %c0_9] : memref<8x1xf32, #tpu.memory_space<vmem>>, vector<8x1xf32>
    tpu.vector_store %arg6[%c0_8, %c0_9], %17 {strides = array<i32>} : memref<8x1xf32, #tpu.memory_space<vmem>>, vector<8x1xf32>,
    return
  }
  func.func @transform_0(%arg0: i32, %arg1: i32) -> (i32, i32) {
    %c0_i32 = arith.constant 0 : i32
    return %arg0, %arg1 : i32, i32
  }
  func.func @transform_1(%arg0: i32, %arg1: i32) -> (i32, i32) {
    %c0_i32 = arith.constant 0 : i32
    return %arg0, %arg1 : i32, i32
  }
  func.func @transform_2(%arg0: i32, %arg1: i32) -> (i32, i32) {
    %c0_i32 = arith.constant 0 : i32
    %c0_i32_0 = arith.constant 0 : i32
    return %arg0, %c0_i32 : i32, i32
  }
  func.func @transform_3(%arg0: i32, %arg1: i32) -> (i32, i32) {
    %c0_i32 = arith.constant 0 : i32
    return %arg0, %arg1 : i32, i32
  }
}

</mosaic_0001>

<bundles_post_ra>
// kernel: tpu_custom_call.1
= control target key start
LH: loop header
LB: loop body
LE: loop exit
PB: predicated region body
PF: predicated region fallthrough
CT: control target
= control target key end

     0   :  { %8 = vsyncpa [#allocation4], 0  ;;  %s287_s0 = inlined_call_operand.vmem [shape: f32[8,128], index: 0, kind: input, shape index: {}]   ;;  %s288_s1 = inlined_call_operand.hbm [shape: f32[8,128], index: 1, kind: input, shape index: {}]   ;;  %s289_s2 = inlined_call_operand.vmem [shape: f32[8,1], index: 2, kind: input, shape index: {}]   ;;  %s290_s3 = inlined_call_operand.hbm [shape: f32[8,128], index: 3, kind: output, shape index: {}]  }
   0x1   :  { %9 = vsyncpa [#allocation5], 0  ;;  %s17_s14 = sshll.u32 %s288_s1, 4  ;;  %s248_s15 = smov [#allocation3]   ;;  %v39_v0 = vlaneseq  ;;  %s18_s14 = int_to_ptr.hbm [resolvable:$true] %s17_s14 }
   0x2   :  { %s19_s16 = sshll.u32 %s248_s15, 4  ;;  %s20_s16 = int_to_ptr.vmem [resolvable:$true] %s19_s16 }
   0x3   :  { %22 = dma.hbm_to_vmem [thread:$0]  %s18_s14, 128, %s20_s16, [#allocation4]  }
   0x4   :  { %244 = dma.done.wait [#allocation4], 128  }
   0x5   :  { %245 = vsyncadd [#allocation4], 4294967168  ;;  %v40_v1 = vshrl.u32 %v39_v0, 7  ;;  %v57_v2 = vand.u32 127, %v39_v0  ;;  %vm34_vm0 = vcmask 7168   ;;  %v249_v7 = vmov 1.0  }
   0x6   :  { %v33_v8 = vld [vmem:[%s289_s2] sm:$0xff]  ;;  %v250_v12 = vmov 0   ;;  %v37_v23 = vld [vmem:[#allocation3] sm:$0xff]  ;;  %s251_s19 = smov [#allocation6]   ;;  %s148_s23 = sshll.u32 %s290_s3, 4  ;;  %s149_s23 = int_to_ptr.hbm [resolvable:$true] %s148_s23 }
   0x7   :  { %v55_v3 = vadd.s32 120, %v40_v1  ;;  %v54_v4 = vadd.s32 112, %v40_v1  ;;  %v53_v5 = vadd.s32 104, %v40_v1  ;;  %v52_v6 = vadd.s32 96, %v40_v1  ;;  %35 = vst.msk [vmem:[#allocation2] sm:$0xff] %vm34_vm0, %v33_v8  ;;  %195 = vset.pattern.permute.xlu0 %v250_v12  ;;  %v36_v22 = vld [vmem:[%s287_s0] sm:$0xff] }
   0x8   :  { %v51_v9 = vadd.s32 88, %v40_v1  ;;  %v50_v10 = vadd.s32 80, %v40_v1  ;;  %v49_v11 = vadd.s32 72, %v40_v1  ;;  %v48_v13 = vadd.s32 64, %v40_v1  ;;  %s146_s20 = sshll.u32 %s251_s19, 4  ;;  %s252_s24 = smov 1   ;;  %s147_s20 = int_to_ptr.vmem [resolvable:$true] %s146_s20 }
   0x9   :  { %vm73_vm1 = vcmp.le.s32.totalorder %v55_v3, %v57_v2  ;;  %vm72_vm2 = vcmp.le.s32.totalorder %v54_v4, %v57_v2  ;;  %vm71_vm3 = vcmp.le.s32.totalorder %v53_v5, %v57_v2  ;;  %vm70_vm4 = vcmp.le.s32.totalorder %v52_v6, %v57_v2 }
   0xa   :  { %174 = vmatpush.msk.msra.mxu0 %vm73_vm1, %v249_v7  ;;  %vm69_vm5 = vcmp.le.s32.totalorder %v51_v9, %v57_v2  ;;  %vm68_vm6 = vcmp.le.s32.totalorder %v50_v10, %v57_v2  ;;  %vm67_vm7 = vcmp.le.s32.totalorder %v49_v11, %v57_v2  ;;  %v47_v15 = vadd.s32 56, %v40_v1 }
   0xb   :  { %vm66_vm8 = vcmp.le.s32.totalorder %v48_v13, %v57_v2  ;;  %v46_v16 = vadd.s32 48, %v40_v1  ;;  %v45_v17 = vadd.s32 40, %v40_v1  ;;  %v44_v18 = vadd.s32 32, %v40_v1 }
   0xc   :  { %175 = vmatpush.msk.msra.mxu0 %vm72_vm2, %v249_v7  ;;  %vm65_vm9 = vcmp.le.s32.totalorder %v47_v15, %v57_v2  ;;  %v43_v19 = vadd.s32 24, %v40_v1  ;;  %v42_v20 = vadd.s32 16, %v40_v1  ;;  %v41_v21 = vadd.s32 8, %v40_v1 }
   0xd   :  { %vm64_vm10 = vcmp.le.s32.totalorder %v46_v16, %v57_v2  ;;  %vm63_vm11 = vcmp.le.s32.totalorder %v45_v17, %v57_v2  ;;  %vm62_vm12 = vcmp.le.s32.totalorder %v44_v18, %v57_v2  ;;  %vm58_vm1 = vcmp.le.s32.totalorder %v40_v1, %v57_v2 }
   0xe   :  { %176 = vmatpush.msk.msra.mxu0 %vm71_vm3, %v249_v7  ;;  %v126_v14 = vld [vmem:[#allocation2] sm:$0xff]  ;;  %vm61_vm13 = vcmp.le.s32.totalorder %v43_v19, %v57_v2  ;;  %vm60_vm14 = vcmp.le.s32.totalorder %v42_v20, %v57_v2  ;;  %vm59_vm15 = vcmp.le.s32.totalorder %v41_v21, %v57_v2  ;;  %v38_v24 = vmul.f32 %v37_v23, %v36_v22 }
   0xf   :  { %129 = vperm.xlu0 %195, %v126_v14  }
  0x10   :  { %177 = vmatpush.msk.msra.mxu0 %vm70_vm4, %v249_v7 }
  0x12   :  { %178 = vmatpush.msk.msra.mxu0 %vm69_vm5, %v249_v7 }
  0x14   :  { %179 = vmatpush.msk.msra.mxu0 %vm68_vm6, %v249_v7 }
  0x16   :  { %180 = vmatpush.msk.msra.mxu0 %vm67_vm7, %v249_v7 }
  0x18   :  { %181 = vmatpush.msk.msra.mxu0 %vm66_vm8, %v249_v7 }
  0x1a   :  { %182 = vmatpush.msk.msra.mxu0 %vm65_vm9, %v249_v7 }
  0x1c   :  { %183 = vmatpush.msk.msra.mxu0 %vm64_vm10, %v249_v7 }
  0x1e   :  { %184 = vmatpush.msk.msra.mxu0 %vm63_vm11, %v249_v7 }
  0x20   :  { %185 = vmatpush.msk.msra.mxu0 %vm62_vm12, %v249_v7 }
  0x22   :  { %186 = vmatpush.msk.msra.mxu0 %vm61_vm13, %v249_v7 }
  0x24   :  { %187 = vmatpush.msk.msra.mxu0 %vm60_vm14, %v249_v7 }
  0x26   :  { %188 = vmatpush.msk.msra.mxu0 %vm59_vm15, %v249_v7 }
  0x28   :  { %189 = vmatpush.msk.msra.mxu0 %vm58_vm1, %v249_v7 }
  0x29   :  { %122 = vmatmul.f32.vlgmr.msra.gmra.mxu0 %v38_v24 }
  0x81   :  { %v130_v25 = vpop.permute.xlu0 %129 }
  0xa6   :  { %v123_v26 = vpop.f32.mrf.mxu0 }
  0xa7   :  { %v132_v27 = vadd.f32 %v130_v25, %v123_v26  ;;  %135 = vrot.lane.b32.xlu0 %v123_v26, %s252_s24 }
  0xa9   :  { %133 = vst [vmem:[#allocation6] sm:$0xff] %v132_v27 }
  0xaa   :  { %151 = dma.vmem_to_hbm [thread:$0]  %s147_s20, 128, %s149_s23, [#allocation5]  }
 0x119   :  { %v136_v28 = vpop.permute.xlu0 %135 }
 0x11a   :  { %v138_v29 = vadd.f32 %v136_v28, %v126_v14 }
 0x11c   :  { %140 = vst.msk [vmem:[#allocation2] sm:$0xff] %vm34_vm0, %v138_v29 }
 0x11d   :  { %246 = dma.done.wait [#allocation5], 128  }
 0x11e   :  { %247 = vsyncadd [#allocation5], 4294967168 }
 0x11f   :  { %156 = vsyncpa [#allocation4], 1 }
 0x120   :  { %157 = vsyncpa [#allocation5], 1 }

</bundles_post_ra>
